<compile_context>
chip_gen: v5e
topology: v5e:2x2
jax: 0.10.0
libtpu: 0.0.40
codegen_flags: <defaults>
</compile_context>

<pallas_src>
import functools

import jax
import jax.numpy as jnp
from jax import lax
from jax.experimental import pallas as pl
from jax.experimental.pallas import tpu as pltpu

_LANES = 128


def _round_up(x, m):
    return ((x + m - 1) // m) * m


def _sse_partial_kernel(pred_ref, tgt_ref, out_ref, *, tile_rows, total_rows,
                        tiles_per_chunk):
    """Accumulates a per-chunk (8, 128) lane/sublane-dense sum of squared errors."""
    p = pl.program_id(0)          # parallel chunk (megacore axis on v7x)
    t = pl.program_id(1)          # reduction step within the chunk

    @pl.when(t == 0)
    def _():
        out_ref[...] = jnp.zeros_like(out_ref)

    # Logical (unclamped) start row of this tile.  The index_map clamps the
    # physical DMA window in bounds; overhang/boundary rows are masked below.
    row_start = (p * tiles_per_chunk + t) * tile_rows
    n_vreg_rows = tile_rows // 8
    interior = row_start + tile_rows <= total_rows

    def _accumulate(d2):
        # (tile_rows, 128) -> (tile_rows//8, 8, 128); summing the leading axis
        # is pure VALU adds into the resident (8, 128) accumulator block.
        out_ref[...] += jnp.sum(d2.reshape(n_vreg_rows, 8, _LANES), axis=0)

    @pl.when(interior)
    def _():
        # Fast path: no masking work for interior tiles (the steady state).
        d = pred_ref[...].astype(jnp.float32) - tgt_ref[...].astype(jnp.float32)
        _accumulate(d * d)

    @pl.when(jnp.logical_not(interior))
    def _():
        # Boundary / overhang tile: mask rows past the end of the slab.
        row_ids = lax.broadcasted_iota(jnp.int32, (tile_rows, _LANES), 0)
        valid = (row_start + row_ids) < total_rows
        d = pred_ref[...].astype(jnp.float32) - tgt_ref[...].astype(jnp.float32)
        _accumulate(jnp.where(valid, d * d, 0.0))


def psnr_loss(prediction, target, value_range=1.0, *, tile_rows=4096,
              num_parallel=2):
    assert prediction.shape == target.shape, "prediction/target shape mismatch"
    n_total = int(prediction.size)
    itemsize = jnp.dtype(prediction.dtype).itemsize

    p_flat = prediction.reshape(-1)
    t_flat = target.reshape(-1)

    main_n = (n_total // _LANES) * _LANES      # 128-aligned prefix
    rows = main_n // _LANES
    # Sublane granularity by dtype packing (f32: 8, bf16/fp16: 16, int8: 32).
    sub = max(8, 32 // itemsize)

    def _jax_sse(a, b):
        d = a.astype(jnp.float32) - b.astype(jnp.float32)
        return jnp.sum(d * d)

    if rows < sub:
        # Tiny input: not worth a kernel launch (also avoids degenerate
        # block-larger-than-array tilings).
        sse = _jax_sse(p_flat, t_flat)
    else:
        # Lane tail (<128 elems) handled in plain JAX; no jnp.pad of the slab.
        if main_n != n_total:
            tail_sse = _jax_sse(p_flat[main_n:], t_flat[main_n:])
        else:
            tail_sse = jnp.float32(0.0)

        p2 = p_flat[:main_n].reshape(rows, _LANES)
        t2 = t_flat[:main_n].reshape(rows, _LANES)

        # --- Tiling: balanced across the (v7x megacore) parallel axis. ---
        num_parallel = max(1, min(int(num_parallel), rows // sub))
        target_rows = _round_up(max(int(tile_rows), sub), sub)
        tiles_per_chunk = max(1, pl.cdiv(rows, num_parallel * target_rows))
        # Re-derive tile_rows so the chunks split the rows evenly (<= target).
        tr = _round_up(pl.cdiv(rows, num_parallel * tiles_per_chunk), sub)
        tr = min(tr, (rows // sub) * sub)          # never exceed the array
        num_blocks = pl.cdiv(rows, tr)
        tiles_per_chunk = pl.cdiv(num_blocks, num_parallel)

        def in_map(p, t):
            # Clamp keeps the DMA window in bounds.  A (rare) overhang step
            # repeats the previous block index -> Pallas elides the copy, and
            # the kernel masks it out via the logical row index.
            return (jnp.minimum(p * tiles_per_chunk + t, num_blocks - 1), 0)

        kernel = functools.partial(
            _sse_partial_kernel, tile_rows=tr, total_rows=rows,
            tiles_per_chunk=tiles_per_chunk)

        cost = pl.CostEstimate(
            flops=3 * main_n,
            transcendentals=0,
            bytes_accessed=2 * main_n * itemsize
            + num_parallel * 8 * _LANES * 4)

        partial_sse = pl.pallas_call(
            kernel,
            out_shape=jax.ShapeDtypeStruct((num_parallel * 8, _LANES),
                                           jnp.float32),
            grid_spec=pltpu.PrefetchScalarGridSpec(
                num_scalar_prefetch=0,
                grid=(num_parallel, tiles_per_chunk),
                in_specs=[
                    pl.BlockSpec((tr, _LANES), in_map),
                    pl.BlockSpec((tr, _LANES), in_map),
                ],
                out_specs=pl.BlockSpec((8, _LANES), lambda p, t: (p, 0)),
            ),
            compiler_params=pltpu.CompilerParams(
                dimension_semantics=("parallel", "arbitrary")),
            cost_estimate=cost,
        )(p2, t2)

        sse = jnp.sum(partial_sse) + tail_sse

    # Tiny epilogue (matches the PyTorch module: returns +PSNR).
    mse = sse / jnp.float32(n_total)
    psnr = (20.0 * jnp.log10(jnp.float32(value_range))
            - 10.0 * jnp.log10(mse))
    return psnr


if __name__ == "__main__":
    key = jax.random.PRNGKey(0)
    k1, k2 = jax.random.split(key)
    # NCHW inputs, as the PyTorch module would receive.
    shape = (2, 4, 16, 16)
    prediction = jax.random.uniform(k1, shape, dtype=jnp.float32)
    target = jax.random.uniform(k2, shape, dtype=jnp.float32)

    psnr = psnr_loss(prediction, target, value_range=1.0)
    jax.block_until_ready(psnr)

    # Reference check in plain JAX (module returns +PSNR).
    mse = jnp.mean((prediction - target) ** 2)
    ref = 20.0 * jnp.log10(jnp.float32(1.0)) - 10.0 * jnp.log10(mse)
    assert jnp.allclose(psnr, ref, rtol=1e-5, atol=1e-5), (psnr, ref)

    print("KERNEL_OK")
</pallas_src>

<mosaic_0001>
module attributes {stable_mosaic.version = 11 : i64} {
  func.func @_sse_partial_kernel(%arg0: i32, %arg1: i32, %arg2: memref<8x128xf32, #tpu.memory_space<vmem>>, %arg3: memref<8x128xf32, #tpu.memory_space<vmem>>, %arg4: memref<8x128xf32, #tpu.memory_space<vmem>>) attributes {dimension_semantics = [#tpu.dimension_semantics<parallel>, #tpu.dimension_semantics<arbitrary>], iteration_bounds = array<i64: 2, 1>, scalar_prefetch = 0 : i64, scratch_operands = 0 : i64, tpu.core_type = #tpu.core_type<tc>, window_params = [{transform_indices = @transform_0, window_bounds = array<i64: 8, 128>}, {transform_indices = @transform_1, window_bounds = array<i64: 8, 128>}, {transform_indices = @transform_2, window_bounds = array<i64: 8, 128>}]} {
    %c0_i32 = arith.constant 0 : i32
    %0 = arith.cmpi eq, %arg1, %c0_i32 : i32
    %1 = arith.extui %0 : i1 to i32
    %c0_i32_0 = arith.constant 0 : i32
    %2 = arith.cmpi ne, %1, %c0_i32_0 : i32
    scf.if %2 {
      %cst = arith.constant 0.000000e+00 : f32
      %13 = vector.broadcast %cst : f32 to vector<8x128xf32>
      %c0 = arith.constant 0 : index
      %c0_4 = arith.constant 0 : index
      %14 = vector.load %arg4[%c0, %c0_4] : memref<8x128xf32, #tpu.memory_space<vmem>>, vector<8x128xf32>
      tpu.vector_store %arg4[%c0, %c0_4], %13 {strides = array<i32>} : memref<8x128xf32, #tpu.memory_space<vmem>>, vector<8x128xf32>,
    } else {
    }
    %c1_i32 = arith.constant 1 : i32
    %3 = arith.muli %arg0, %c1_i32 : i32
    %4 = arith.addi %3, %arg1 : i32
    %c8_i32 = arith.constant 8 : i32
    %5 = arith.muli %4, %c8_i32 : i32
    %c8_i32_1 = arith.constant 8 : i32
    %6 = arith.addi %5, %c8_i32_1 : i32
    %c16_i32 = arith.constant 16 : i32
    %7 = arith.cmpi sle, %6, %c16_i32 : i32
    %8 = arith.extui %7 : i1 to i32
    %c0_i32_2 = arith.constant 0 : i32
    %9 = arith.cmpi ne, %8, %c0_i32_2 : i32
    scf.if %9 {
      %c0 = arith.constant 0 : index
      %c0_4 = arith.constant 0 : index
      %13 = vector.load %arg2[%c0, %c0_4] : memref<8x128xf32, #tpu.memory_space<vmem>>, vector<8x128xf32>
      %c0_5 = arith.constant 0 : index
      %c0_6 = arith.constant 0 : index
      %14 = vector.load %arg3[%c0_5, %c0_6] : memref<8x128xf32, #tpu.memory_space<vmem>>, vector<8x128xf32>
      %15 = arith.subf %13, %14 : vector<8x128xf32>
      %16 = arith.mulf %15, %15 : vector<8x128xf32>
      %c0_7 = arith.constant 0 : index
      %c0_8 = arith.constant 0 : index
      %17 = vector.load %arg4[%c0_7, %c0_8] : memref<8x128xf32, #tpu.memory_space<vmem>>, vector<8x128xf32>
      %18 = vector.shape_cast %16 : vector<8x128xf32> to vector<1x8x128xf32>
      %cst = arith.constant dense<0.000000e+00> : vector<8x128xf32>
      %19 = vector.multi_reduction <add>, %18, %cst [0] : vector<1x8x128xf32> to vector<8x128xf32>
      %20 = arith.addf %17, %19 : vector<8x128xf32>
      %c0_9 = arith.constant 0 : index
      %c0_10 = arith.constant 0 : index
      %21 = vector.load %arg4[%c0_9, %c0_10] : memref<8x128xf32, #tpu.memory_space<vmem>>, vector<8x128xf32>
      tpu.vector_store %arg4[%c0_9, %c0_10], %20 {strides = array<i32>} : memref<8x128xf32, #tpu.memory_space<vmem>>, vector<8x128xf32>,
    } else {
    }
    %true = arith.constant true
    %10 = arith.xori %7, %true : i1
    %11 = arith.extui %10 : i1 to i32
    %c0_i32_3 = arith.constant 0 : i32
    %12 = arith.cmpi ne, %11, %c0_i32_3 : i32
    scf.if %12 {
      %13 = tpu.iota {dimensions = array<i32: 0>} : vector<8x128xi32>
      %14 = vector.broadcast %5 : i32 to vector<8x128xi32>
      %15 = arith.addi %14, %13 : vector<8x128xi32>
      %c16_i32_4 = arith.constant 16 : i32
      %16 = vector.broadcast %c16_i32_4 : i32 to vector<8x128xi32>
      %17 = arith.cmpi slt, %15, %16 : vector<8x128xi32>
      %c0 = arith.constant 0 : index
      %c0_5 = arith.constant 0 : index
      %18 = vector.load %arg2[%c0, %c0_5] : memref<8x128xf32, #tpu.memory_space<vmem>>, vector<8x128xf32>
      %c0_6 = arith.constant 0 : index
      %c0_7 = arith.constant 0 : index
      %19 = vector.load %arg3[%c0_6, %c0_7] : memref<8x128xf32, #tpu.memory_space<vmem>>, vector<8x128xf32>
      %20 = arith.subf %18, %19 : vector<8x128xf32>
      %21 = arith.mulf %20, %20 : vector<8x128xf32>
      %cst = arith.constant 0.000000e+00 : f32
      %22 = vector.broadcast %cst : f32 to vector<8x128xf32>
      %23 = arith.select %17, %21, %22 : vector<8x128xi1>, vector<8x128xf32>
      %c0_8 = arith.constant 0 : index
      %c0_9 = arith.constant 0 : index
      %24 = vector.load %arg4[%c0_8, %c0_9] : memref<8x128xf32, #tpu.memory_space<vmem>>, vector<8x128xf32>
      %25 = vector.shape_cast %23 : vector<8x128xf32> to vector<1x8x128xf32>
      %cst_10 = arith.constant dense<0.000000e+00> : vector<8x128xf32>
      %26 = vector.multi_reduction <add>, %25, %cst_10 [0] : vector<1x8x128xf32> to vector<8x128xf32>
      %27 = arith.addf %24, %26 : vector<8x128xf32>
      %c0_11 = arith.constant 0 : index
      %c0_12 = arith.constant 0 : index
      %28 = vector.load %arg4[%c0_11, %c0_12] : memref<8x128xf32, #tpu.memory_space<vmem>>, vector<8x128xf32>
      tpu.vector_store %arg4[%c0_11, %c0_12], %27 {strides = array<i32>} : memref<8x128xf32, #tpu.memory_space<vmem>>, vector<8x128xf32>,
    } else {
    }
    return
  }
  func.func @transform_0(%arg0: i32, %arg1: i32) -> (i32, i32) {
    %c1_i32 = arith.constant 1 : i32
    %0 = arith.muli %arg0, %c1_i32 : i32
    %1 = arith.addi %0, %arg1 : i32
    %c1_i32_0 = arith.constant 1 : i32
    %2 = arith.minsi %1, %c1_i32_0 : i32
    %c0_i32 = arith.constant 0 : i32
    %c0_i32_1 = arith.constant 0 : i32
    return %2, %c0_i32 : i32, i32
  }
  func.func @transform_1(%arg0: i32, %arg1: i32) -> (i32, i32) {
    %c1_i32 = arith.constant 1 : i32
    %0 = arith.muli %arg0, %c1_i32 : i32
    %1 = arith.addi %0, %arg1 : i32
    %c1_i32_0 = arith.constant 1 : i32
    %2 = arith.minsi %1, %c1_i32_0 : i32
    %c0_i32 = arith.constant 0 : i32
    %c0_i32_1 = arith.constant 0 : i32
    return %2, %c0_i32 : i32, i32
  }
  func.func @transform_2(%arg0: i32, %arg1: i32) -> (i32, i32) {
    %c0_i32 = arith.constant 0 : i32
    %c0_i32_0 = arith.constant 0 : i32
    return %arg0, %c0_i32 : i32, i32
  }
}

</mosaic_0001>

<bundles_post_ra>
// kernel: tpu_custom_call.1
= control target key start
LH: loop header
LB: loop body
LE: loop exit
PB: predicated region body
PF: predicated region fallthrough
CT: control target
= control target key end

     0   :  { %s866_s0 = inlined_call_operand.hbm [shape: f32[16,128], index: 0, kind: input, shape index: {}]   ;;  %s867_s1 = inlined_call_operand.hbm [shape: f32[16,128], index: 1, kind: input, shape index: {}]   ;;  %s868_s2 = inlined_call_operand.hbm [shape: f32[16,128], index: 2, kind: output, shape index: {}]  }
   0x1   :  { %871 = sst [smem:[#allocation13_spill]] %s866_s0 }
   0x2   :  { %7 = vsyncpa [#allocation3], 0 }
   0x3   :  { %9 = vsyncpa [#allocation3 + $0x1], 0 }
   0x4   :  { %10 = vsyncpa [#allocation6], 0 }
   0x5   :  { %12 = vsyncpa [#allocation6 + $0x1], 0 }
   0x6   :  { %13 = vsyncpa [#allocation4], 0 }
   0x7   :  { %15 = vsyncpa [#allocation4 + $0x1], 0  ;;  %s690_s9 = smov 0   ;;  %s692_s10 = smov 0  }
   0x8   :  { %s694_s11 = smov 0   ;;  %s696_s12 = smov 0  }
   0x9   :  { %s698_s13 = smov 0   ;;  %s700_s14 = smov 0  }
   0xa   :  { %s702_s15 = smov 0   ;;  %s704_s16 = smov 0  }
   0xb   :  { %s706_s17 = smov 0  }
   0xc LB: > { %872 = sst [smem:[#allocation11_spill]] %s668_s16  ;;  %s391_s18 = sadd.s32 4294967295, %s672_s17   ;;  %s672_s17 = sphi %s706_s17, %s21_s17   ;;  %s668_s16 = sphi %s704_s16, %s880_s16   ;;  %s664_s15 = sphi %s702_s15, %s879_s15   ;;  %s660_s14 = sphi %s700_s14, %s886_s14   ;;  %s656_s13 = sphi %s698_s13, %s885_s13   ;;  %s652_s12 = sphi %s696_s12, %s884_s12   ;;  %s648_s11 = sphi %s694_s11, %s883_s11   ;;  %s644_s10 = sphi %s692_s10, %s882_s10   ;;  %s640_s9 = sphi %s690_s9, %s881_s9  }
   0xd   : > { %s392_s19 = sadd.s32 4294967294, %s672_s17   ;;  %s33_s20 = sadd.s32 1, %s668_s16 }
   0xe   : > { %p38_p0 = scmp.lt.s32.totalorder %s668_s16, 1  ;;  %p35_p1 = scmp.ge.s32.totalorder %s33_s20, 2 }
   0xf   : > { %s46_s21 = sadd.s32 1, %s660_s14  ;;  %p53_p2 = scmp.ne.s32.totalorder %s660_s14, %s656_s13 }
  0x10   : > { %s739_s22 = scalar_select %p38_p0, %s668_s16, 1 }
  0x11   : > { %s888_s20 = smov (%p35_p1, %s33_s20), 0  ;;  %p54_p3 = scmp.eq.s32.totalorder %s672_s17, 0 }
  0x12   : > { %873 = sst [smem:[#allocation12_spill]] %s888_s20  ;;  %p41_p4 = scmp.lt.s32.totalorder %s888_s20, 1 }
  0x13   : > { %p59_p5 = scmp.ne.s32.totalorder %s656_s13, %s652_s12  ;;  %p748_p6 = por %p54_p3, %p53_p2 }
  0x14   : > { %p60_p7 = scmp.eq.s32.totalorder %s391_s18, 0  ;;  %s101_s26 = ssub.s32 %s668_s16, %s888_s20 }
  0x15   : > { %s42_s24 = scalar_select %p41_p4, %s888_s20, 1 }
  0x16   : > { %p753_p8 = por %p60_p7, %p59_p5  ;;  %p102_p9 = scmp.eq.s32.totalorder %s101_s26, 0 }
  0x17   : > { %s43_s27 = ssub.s32 %s739_s22, %s42_s24  ;;  %s104_s28 = sadd.s32 1, %s648_s11 }
  0x18   : > { %p44_p10 = scmp.eq.s32.totalorder %s43_s27, 0  ;;  %p114_p11 = scmp.ne.s32.totalorder %s648_s11, %s644_s10 }
  0x19   : > { %s762_s29 = scalar_select %p102_p9, %s648_s11, %s104_s28  }
  0x1a   : > { %s765_s30 = scalar_select %p44_p10, %s660_s14, %s46_s21  }
  0x1b   : > { %p115_p12 = scmp.eq.s32.totalorder %s391_s18, 1  ;;  %p120_p13 = scmp.ne.s32.totalorder %s644_s10, %s640_s9 }
  0x1c   : > { %p121_p0 = scmp.eq.s32.totalorder %s392_s19, 1  ;;  %p394_p2 = scmp.ge.s32.totalorder %s672_s17, 2 }
  0x1d   : > { %p771_p1 = por %p115_p12, %p114_p11  ;;  %p427_p4 = scmp.lt.s32.totalorder %s672_s17, 2 }
  0x1e   : > { %p776_p3 = por %p121_p0, %p120_p13  ;;  %s141_s5 = sand.u32 1, %s660_s14  }
  0x1f   : > { %s396_s6 = sshll.u32 %s739_s22, 3  ;;  %s395_s7 = sshll.u32 %s141_s5, 3 }
  0x20   : > { %s878_s0 = sld [smem:[#allocation13_spill]]  ;;  %s145_s19 = scalar_lea.vmem [#allocation2], %s395_s7 }
  0x21   : > { %s156_s24 = sshll.u32 %s145_s19, 4  ;;  %p417_p5 = pnand %p427_p4, %p748_p6  ;;  %s157_s24 = int_to_ptr.vmem [resolvable:$true] %s156_s24 }
  0x22   : > { %p399_p7 = scmp.ge.s32.totalorder %s672_s17, 1  ;;  %p183_p9 = scmp.lt.s32.totalorder %s672_s17, 3 }
  0x23   : > { %s142_s26 = scalar_lea.sflag [#allocation3], %s141_s5  ;;  %s174_s22 = scalar_lea.hbm %s867_s1, %s396_s6 }
  0x24   : > { %p184_p10 = pnand %p399_p7, %p183_p9  ;;  %s176_s20 = sshll.u32 %s174_s22, 4  ;;  %s177_s20 = int_to_ptr.hbm [resolvable:$true] %s176_s20 }
  0x25   : > { %s167_s16 = scalar_lea.vmem [#allocation5], %s395_s7  ;;  %s164_s12 = scalar_lea.sflag [#allocation6], %s141_s5 }
  0x26   : > { %s152_s18 = scalar_lea.hbm %s878_s0, %s396_s6  ;;  %s178_s8 = sshll.u32 %s167_s16, 4  ;;  %s179_s8 = int_to_ptr.vmem [resolvable:$true] %s178_s8 }
  0x27   : > { %s154_s21 = sshll.u32 %s152_s18, 4  ;;  %187 = sbr.rel (%p184_p10) target bundleno = 97 (0x61), region = 28  ;;  %s155_s21 = int_to_ptr.hbm [resolvable:$true] %s154_s21 }
  0x28   : > { %419 = dma.hbm_to_vmem [thread:$0]  (!%p417_p5), %s155_s21, 128, %s157_s24, %s142_s26  }
  0x29   : > { %422 = dma.hbm_to_vmem [thread:$0]  (!%p417_p5), %s177_s20, 128, %s179_s8, %s164_s12  }
  0x2a   : > { %s189_s23 = sand.u32 (!%p184_p10), 1, %s656_s13  }
  0x2b   : > { %s400_s18 = sshll.u32 (!%p184_p10), %s189_s23, 3  ;;  %s190_s19 = scalar_lea.sflag (!%p184_p10), [#allocation3], %s189_s23 }
  0x2c   : > { %s193_s0 = scalar_lea.vmem [#allocation2], %s400_s18 }
  0x2d   : > { %627 = dma.done.wait (%p753_p8), %s190_s19, 128  }
  0x2e   : > { %629 = vsyncadd (%p753_p8), %s190_s19, 4294967168  ;;  %s200_s6 = scalar_lea.sflag [#allocation6], %s189_s23  ;;  %s203_s7 = scalar_lea.vmem [#allocation5], %s400_s18 }
  0x2f   : > { %631 = dma.done.wait (%p753_p8), %s200_s6, 128  }
  0x30   : > { %633 = vsyncadd (%p753_p8), %s200_s6, 4294967168  ;;  %s227_s16 = sand.u32 1, %s644_s10   ;;  %s804_s20 = sshll.u32 %s664_s15, 3  ;;  %v674_v0 = vmov 0.0  }
  0x31   : > { %s402_s5 = sshll.u32 %s227_s16, 3  ;;  %s243_s21 = sadd.s32 8, %s804_s20 }
  0x32   : > { %s809_s24 = scalar_lea.vmem [#allocation7], %s402_s5  ;;  %p404_p6 = scmp.gt.s32.totalorder %s243_s21, 16 }
  0x33   : > { %240 = vst [vmem:[%s809_s24] sm:$0xff] %v674_v0 }
  0x34   : > { %247 = sbr.rel (%p404_p6) target bundleno = 65 (0x41), region = 44 }
  0x39   : > { %v248_v1 = vld [vmem:[%s193_s0] sm:$0xff]  ;;  %v249_v2 = vld [vmem:[%s203_s7] sm:$0xff] }
  0x3a   : > { %v250_v3 = vsub.f32 %v248_v1, %v249_v2  ;;  %v252_v4 = vld [vmem:[%s809_s24] sm:$0xff] }
  0x3c   : > { %v251_v5 = vmul.f32 %v250_v3, %v250_v3 }
  0x3e   : > { %v254_v6 = vadd.f32 %v252_v4, %v251_v5 }
  0x40   : > { %255 = vst [vmem:[%s809_s24] sm:$0xff] %v254_v6 }
  0x41 PF: > { %p405_p8 = scmp.le.s32.totalorder %s243_s21, 16 }
  0x43   : > { %259 = sbr.rel (%p405_p8) target bundleno = 83 (0x53), region = 48 }
  0x48   : > { %v260_v7 = vlaneseq  ;;  %v265_v8 = vld [vmem:[%s193_s0] sm:$0xff]  ;;  %v266_v9 = vld [vmem:[%s203_s7] sm:$0xff]  ;;  %v262_v10 = vstv %s804_s20 }
  0x49   : > { %v267_v11 = vsub.f32 %v265_v8, %v266_v9  ;;  %v270_v15 = vld [vmem:[%s809_s24] sm:$0xff] }
  0x4a   : > { %v261_v12 = vshrl.u32 %v260_v7, 7 }
  0x4b   : > { %v268_v13 = vmul.f32 %v267_v11, %v267_v11 }
  0x4c   : > { %v263_v14 = vadd.s32 %v262_v10, %v261_v12 }
  0x4e   : > { %vm264_vm0 = vcmp.lt.s32.totalorder %v263_v14, 16 }
  0x4f   : > { %v269_v16 = vsel %vm264_vm0, %v268_v13, 0.0 }
  0x50   : > { %v272_v17 = vadd.f32 %v270_v15, %v269_v16 }
  0x52   : > { %273 = vst [vmem:[%s809_s24] sm:$0xff] %v272_v17 }
  0x53 PF: > { %s285_s0 = scalar_lea.hbm %s868_s2, %s804_s20  ;;  %s287_s26 = sshll.u32 %s809_s24, 4  ;;  %s288_s26 = int_to_ptr.vmem [resolvable:$true] %s287_s26 }
  0x54   : > { %s289_s27 = sshll.u32 %s285_s0, 4  ;;  %s275_s28 = scalar_lea.sflag [#allocation4], %s227_s16  ;;  %s290_s27 = int_to_ptr.hbm [resolvable:$true] %s289_s27 }
  0x55   : > { %s576_s22 = sshra.s32 %s290_s27, 4  ;;  %s582_s18 = scalar_lea.hbm %s868_s2, 16  ;;  %s577_s22 = int_to_ptr.hbm [resolvable:$true] %s576_s22 }
  0x56   : > { %s578_s8 = scalar_lea.hbm %s577_s22, 8  ;;  %p583_p0 = scmp.lt.s32.totalorder %s577_s22, %s868_s2 }
  0x57   : > { %p579_p11 = scmp.ne.s32.totalorder %s577_s22, %s578_s8  ;;  %p584_p4 = scmp.lt.s32.totalorder %s582_s18, %s578_s8 }
  0x59   : > { %p580_p12 = pnand %p579_p11, %p771_p1  ;;  %p585_p5 = por %p584_p4, %p583_p0 }
  0x5b   : > { %p581_p13 = pneg %p580_p12 }
  0x5d   : > { %p586_p7 = pnand %p585_p5, %p581_p13 }
  0x5f   : > { %589 = shalt.err (!%p586_p7)
}
  0x60   : > { %414 = dma.vmem_to_hbm [thread:$0]  (%p771_p1), %s288_s26, 128, %s290_s27, %s275_s28  }
  0x61 PF: > { %s301_s7 = sand.u32 1, %s640_s9   ;;  %p424_p9 = pnand %p394_p2, %p776_p3 }
  0x62   : > { %s302_s16 = scalar_lea.sflag [#allocation4], %s301_s7 }
  0x63   : > { %p425_p10 = pneg %p424_p9 }
  0x65   : > { %635 = dma.done.wait (%p425_p10), %s302_s16, 128  }
  0x66   : > { %637 = vsyncadd (%p425_p10), %s302_s16, 4294967168  ;;  %s21_s17 = sadd.s32 1, %s672_s17   ;;  %s879_s15 = sld [smem:[#allocation11_spill]] }
  0x67   : > { %p18_p6 = scmp.ge.s32.totalorder %s21_s17, 4   ;;  %s880_s16 = sld [smem:[#allocation12_spill]] }
  0x68   : > { %s881_s9 = smov %s644_s10  ;;  %s882_s10 = smov %s648_s11 }
  0x69   : > { %s883_s11 = smov %s762_s29  ;;  %s884_s12 = smov %s656_s13 }
  0x6a   : > { %s885_s13 = smov %s660_s14  ;;  %s886_s14 = smov %s765_s30 }
  0x6b   :  { %20 = sbr.rel (!%p18_p6) target bundleno = 12 (0xc), region = 98 }
  0x70   :  { %308 = vsyncpa [#allocation3], 1 }
  0x71   :  { %310 = vsyncpa [#allocation3 + $0x1], 1 }
  0x72   :  { %311 = vsyncpa [#allocation6], 1 }
  0x73   :  { %313 = vsyncpa [#allocation6 + $0x1], 1 }
  0x74   :  { %314 = vsyncpa [#allocation4], 1 }
  0x75   :  { %316 = vsyncpa [#allocation4 + $0x1], 1 }

</bundles_post_ra>
